<compile_context>
chip_gen: v5e
topology: v5e:2x2
jax: 0.10.0
libtpu: 0.0.40
codegen_flags: <defaults>
</compile_context>

<pallas_src>
import functools
import math

import jax
import jax.numpy as jnp
from jax.experimental import pallas as pl
from jax.experimental.pallas import tpu as pltpu

LN_EPS = 1e-5


def _round_up(n, m):
    return ((n + m - 1) // m) * m


def _state_coupling_kernel(x_ref, wr_ref, wv_ref, br_ref, bv_ref,
                           gamma_ref, beta_ref, o_ref,
                           acc_r_ref, acc_v_ref, *, nk, use_bf16):
    """One (row-tile, K-tile) grid step.

    grid = (rows, K).  K is the contraction ("arbitrary") axis; the two f32
    accumulators persist in VMEM scratch across it and the sigmoid * value ->
    LayerNorm epilogue runs once, on the last K step.  With nk == 1 this
    degenerates to a single fused projection + epilogue per row tile.
    """
    k = pl.program_id(1)

    @pl.when(k == 0)
    def _init():
        acc_r_ref[...] = jnp.zeros_like(acc_r_ref)
        acc_v_ref[...] = jnp.zeros_like(acc_v_ref)

    x = x_ref[...]
    if use_bf16 and x.dtype != jnp.bfloat16:
        x = x.astype(jnp.bfloat16)      # cheap VPU cast; keeps the MXU in bf16

    # Both projections share the same LHS tile; f32 accumulation on the MXU.
    acc_r_ref[...] += jnp.dot(x, wr_ref[...], preferred_element_type=jnp.float32)
    acc_v_ref[...] += jnp.dot(x, wv_ref[...], preferred_element_type=jnp.float32)

    @pl.when(k == nk - 1)
    def _epilogue():
        # Epilogue entirely in f32 (v5e VPU/EUP has no bf16 path).
        gate = jax.nn.sigmoid(acc_r_ref[...] + br_ref[...])
        value = acc_v_ref[...] + bv_ref[...]
        g = gate * value
        mean = jnp.mean(g, axis=-1, keepdims=True)
        centered = g - mean
        var = jnp.mean(centered * centered, axis=-1, keepdims=True)
        normed = centered * jax.lax.rsqrt(var + LN_EPS)
        o_ref[...] = (normed * gamma_ref[...] + beta_ref[...]).astype(o_ref.dtype)


def _vmem_budget_bytes():
    """~85% of per-core VMEM (v5e/v6e: 128 MiB, v7x: 64 MiB per TensorCore)."""
    try:
        cap = int(pltpu.get_tpu_info().vmem_capacity_bytes)
    except Exception:
        cap = 64 << 20          # conservative fallback (v7x per-TC size)
    return int(cap * 0.85)


def _choose_config(n_rows, d, x_itemsize, w_itemsize, vmem_budget):
    """Pick (row_tile, k_tile, num_k_tiles) from the VMEM budget."""
    # --- K (contraction) tiling: only when both weights can't stay resident.
    w_total = 2 * d * d * w_itemsize            # Wr^T + Wv^T, single-buffered
    if w_total <= vmem_budget // 2 or d % 128 != 0:
        # TODO(synk): a very large, ragged D (not a multiple of 128) would need
        # a K-padded copy before K-tiling; unrealistic for this module.
        nk, tk = 1, d
        resident_w = w_total
    else:
        tk = 128
        while (d % (tk * 2) == 0
               and 2 * 2 * (tk * 2) * d * w_itemsize <= vmem_budget // 2):
            tk *= 2
        nk = d // tk
        resident_w = 2 * 2 * tk * d * w_itemsize    # double-buffered K blocks

    # --- Row tile: biggest that fits the remaining budget (>= 8, mult. of 8).
    per_row = (2 * tk * x_itemsize      # double-buffered x block
               + 2 * d * x_itemsize     # double-buffered output block
               + 2 * d * 4              # two f32 accumulators
               + 3 * d * 4)             # epilogue f32 temporaries
    avail = vmem_budget - resident_w - (2 << 20)
    tile = min(1024, max(avail // per_row, 8))
    if n_rows > 8:
        # Keep >= 2 row steps so a 2-TensorCore chip (v7x) can split the grid.
        tile = min(tile, _round_up(pl.cdiv(n_rows, 2), 8))
    tile = min(tile, _round_up(n_rows, 8))
    tile = max((tile // 8) * 8, 8)
    return tile, tk, nk


def _spec(shape, index_map, pipeline_mode=None):
    if pipeline_mode is None:
        return pl.BlockSpec(shape, index_map)
    return pl.BlockSpec(shape, index_map, pipeline_mode=pipeline_mode)


@functools.partial(
    jax.jit,
    static_argnames=("tile", "tk", "nk", "use_bf16", "single_buffer",
                     "vmem_limit"))
def _state_coupling_call(x2d, wr2d, wv2d, br2d, bv2d, gamma2d, beta2d, *,
                         tile, tk, nk, use_bf16, single_buffer, vmem_limit):
    n, d = x2d.shape
    grid_rows = pl.cdiv(n, tile)
    x_isz = jnp.dtype(x2d.dtype).itemsize
    w_isz = jnp.dtype(wr2d.dtype).itemsize

    # Grid-invariant operands get a single VMEM buffer (no point double-
    # buffering a block whose index_map never changes).  Weight blocks move
    # along K when nk > 1, so keep default double-buffering there for overlap.
    const_pm = pl.Buffered(1) if single_buffer else None
    w_pm = pl.Buffered(1) if (single_buffer and nk == 1) else None

    kernel = functools.partial(_state_coupling_kernel, nk=nk, use_bf16=use_bf16)

    cost = pl.CostEstimate(
        flops=4 * n * d * d + 10 * n * d,
        transcendentals=n * (d + 1),
        bytes_accessed=(2 * n * d * x_isz
                        + 2 * d * d * w_isz * (grid_rows if nk > 1 else 1)),
    )

    return pl.pallas_call(
        kernel,
        out_shape=jax.ShapeDtypeStruct((n, d), x2d.dtype),
        grid_spec=pltpu.PrefetchScalarGridSpec(
            num_scalar_prefetch=0,
            grid=(grid_rows, nk),
            in_specs=[
                _spec((tile, tk), lambda i, k: (i, k)),            # x rows x K
                _spec((tk, d), lambda i, k: (k, 0), w_pm),         # Wr^T
                _spec((tk, d), lambda i, k: (k, 0), w_pm),         # Wv^T
                _spec((1, d), lambda i, k: (0, 0), const_pm),      # br
                _spec((1, d), lambda i, k: (0, 0), const_pm),      # bv
                _spec((1, d), lambda i, k: (0, 0), const_pm),      # gamma
                _spec((1, d), lambda i, k: (0, 0), const_pm),      # beta
            ],
            out_specs=pl.BlockSpec((tile, d), lambda i, k: (i, 0)),
            scratch_shapes=[pltpu.VMEM((tile, d), jnp.float32),
                            pltpu.VMEM((tile, d), jnp.float32)],
        ),
        compiler_params=pltpu.CompilerParams(
            dimension_semantics=("parallel", "arbitrary"),
            vmem_limit_bytes=int(vmem_limit)),
        cost_estimate=cost,
    )(x2d, wr2d, wv2d, br2d, bv2d, gamma2d, beta2d)


_SINGLE_BUFFER_OK = True   # flipped off if this jax build rejects pl.Buffered(1)


def state_coupling(x, wr_t, br, wv_t, bv, gamma, beta, *,
                   use_bf16_matmul=True, force_num_k_tiles=None):
    """LayerNorm(sigmoid(x @ Wr^T + br) * (x @ Wv^T + bv)) for x of shape (..., D).

    wr_t / wv_t are the pre-transposed (D, D) linear weights so the kernel
    computes x @ W_t directly (same math as PyTorch's x @ W^T).
    """
    global _SINGLE_BUFFER_OK

    d = x.shape[-1]
    n = math.prod(x.shape[:-1])
    x2d = x.reshape(n, d)            # row-major metadata reshape; no HBM copy

    w_dtype = jnp.bfloat16 if use_bf16_matmul else x.dtype
    wr2d = wr_t.astype(w_dtype)
    wv2d = wv_t.astype(w_dtype)
    br2d = br.astype(jnp.float32).reshape(1, d)
    bv2d = bv.astype(jnp.float32).reshape(1, d)
    gamma2d = gamma.astype(jnp.float32).reshape(1, d)
    beta2d = beta.astype(jnp.float32).reshape(1, d)

    vmem_budget = _vmem_budget_bytes()
    tile, tk, nk = _choose_config(n, d, jnp.dtype(x.dtype).itemsize,
                                  jnp.dtype(w_dtype).itemsize, vmem_budget)
    if force_num_k_tiles is not None and force_num_k_tiles > 1:
        assert d % force_num_k_tiles == 0
        tk = d // force_num_k_tiles
        assert tk % 128 == 0, "K tiles must be multiples of 128 lanes"
        nk = force_num_k_tiles

    static = dict(tile=tile, tk=tk, nk=nk, use_bf16=use_bf16_matmul,
                  vmem_limit=vmem_budget)
    args = (x2d, wr2d, wv2d, br2d, bv2d, gamma2d, beta2d)

    out2d = None
    if _SINGLE_BUFFER_OK:
        try:
            out2d = _state_coupling_call(*args, single_buffer=True, **static)
        except Exception:
            # pl.Buffered(1) not supported by this build: fall back to the
            # default double-buffered pipeline (correct, slightly more VMEM).
            _SINGLE_BUFFER_OK = False
    if out2d is None:
        out2d = _state_coupling_call(*args, single_buffer=False, **static)
    return out2d.reshape(x.shape)


def reference_forward(x, wr_t, br, wv_t, bv, gamma, beta):
    gate = jax.nn.sigmoid(x @ wr_t + br)
    value = x @ wv_t + bv
    g = gate * value
    mean = jnp.mean(g, axis=-1, keepdims=True)
    var = jnp.mean((g - mean) ** 2, axis=-1, keepdims=True)
    return (g - mean) * jax.lax.rsqrt(var + LN_EPS) * gamma + beta


if __name__ == "__main__":
    B, S, D = 2, 8, 32   # batch, seq, input_dim

    key = jax.random.PRNGKey(0)
    kx, kwr, kbr, kwv, kbv = jax.random.split(key, 5)

    x = jax.random.normal(kx, (B, S, D), dtype=jnp.float32)

    # nn.Linear-style uniform(-1/sqrt(D), 1/sqrt(D)) init.
    bound = 1.0 / (D ** 0.5)
    wr = jax.random.uniform(kwr, (D, D), minval=-bound, maxval=bound)  # (out, in)
    br = jax.random.uniform(kbr, (D,), minval=-bound, maxval=bound)
    wv = jax.random.uniform(kwv, (D, D), minval=-bound, maxval=bound)
    bv = jax.random.uniform(kbv, (D,), minval=-bound, maxval=bound)
    gamma = jnp.ones((D,), jnp.float32)     # LayerNorm affine defaults
    beta = jnp.zeros((D,), jnp.float32)

    wr_t, wv_t = wr.T, wv.T
    ref = reference_forward(x, wr_t, br, wv_t, bv, gamma, beta)

    # 1) Fast path: bf16 through the MXU, f32 accumulation + epilogue.
    out = jax.block_until_ready(
        state_coupling(x, wr_t, br, wv_t, bv, gamma, beta))
    assert out.shape == (B, S, D)
    assert jnp.allclose(out, ref, atol=5e-2, rtol=5e-2), "bf16 path mismatch"

    # 2) Exact path: f32 end to end, tight tolerance vs the JAX reference.
    out_f32 = jax.block_until_ready(
        state_coupling(x, wr_t, br, wv_t, bv, gamma, beta,
                       use_bf16_matmul=False))
    assert jnp.allclose(out_f32, ref, atol=1e-5, rtol=1e-5), "f32 path mismatch"

    # 3) Exercise the K-tiled accumulator path (normally used only when the
    #    weights would not fit in VMEM) at a small, 128-aligned feature size,
    #    and check it against the un-tiled kernel path (same precision).
    D2 = 256
    k2 = jax.random.split(jax.random.PRNGKey(1), 5)
    b2 = 1.0 / (D2 ** 0.5)
    x2 = jax.random.normal(k2[0], (B, S, D2), dtype=jnp.float32)
    wr2 = jax.random.uniform(k2[1], (D2, D2), minval=-b2, maxval=b2)
    br2 = jax.random.uniform(k2[2], (D2,), minval=-b2, maxval=b2)
    wv2 = jax.random.uniform(k2[3], (D2, D2), minval=-b2, maxval=b2)
    bv2 = jax.random.uniform(k2[4], (D2,), minval=-b2, maxval=b2)
    g2 = jnp.ones((D2,), jnp.float32)
    be2 = jnp.zeros((D2,), jnp.float32)
    ref2 = reference_forward(x2, wr2.T, br2, wv2.T, bv2, g2, be2)

    out2_nok = jax.block_until_ready(
        state_coupling(x2, wr2.T, br2, wv2.T, bv2, g2, be2,
                       use_bf16_matmul=False))
    out2_kt = jax.block_until_ready(
        state_coupling(x2, wr2.T, br2, wv2.T, bv2, g2, be2,
                       use_bf16_matmul=False, force_num_k_tiles=2))
    assert jnp.allclose(out2_kt, out2_nok, atol=1e-5, rtol=1e-5), \
        "K-tiled path disagrees with single-K path"
    assert jnp.allclose(out2_nok, ref2, atol=5e-2, rtol=5e-2), \
        "D=256 sanity check vs reference failed"

    print("KERNEL_OK")
</pallas_src>

<mosaic_0001>
module attributes {stable_mosaic.version = 11 : i64} {
  func.func @_state_coupling_kernel(%arg0: i32, %arg1: i32, %arg2: memref<8x32xf32, #tpu.memory_space<vmem>>, %arg3: memref<32x32xbf16, #tpu.memory_space<vmem>>, %arg4: memref<32x32xbf16, #tpu.memory_space<vmem>>, %arg5: memref<1x32xf32, #tpu.memory_space<vmem>>, %arg6: memref<1x32xf32, #tpu.memory_space<vmem>>, %arg7: memref<1x32xf32, #tpu.memory_space<vmem>>, %arg8: memref<1x32xf32, #tpu.memory_space<vmem>>, %arg9: memref<8x32xf32, #tpu.memory_space<vmem>>, %arg10: memref<8x32xf32, #tpu.memory_space<vmem>>, %arg11: memref<8x32xf32, #tpu.memory_space<vmem>>) attributes {dimension_semantics = [#tpu.dimension_semantics<parallel>, #tpu.dimension_semantics<arbitrary>], iteration_bounds = array<i64: 2, 1>, scalar_prefetch = 0 : i64, scratch_operands = 2 : i64, tpu.core_type = #tpu.core_type<tc>, window_params = [{transform_indices = @transform_0, window_bounds = array<i64: 8, 32>}, {pipeline_mode = #tpu.pipeline_mode<synchronous>, transform_indices = @transform_1, window_bounds = array<i64: 32, 32>}, {pipeline_mode = #tpu.pipeline_mode<synchronous>, transform_indices = @transform_2, window_bounds = array<i64: 32, 32>}, {pipeline_mode = #tpu.pipeline_mode<synchronous>, transform_indices = @transform_3, window_bounds = array<i64: 1, 32>}, {pipeline_mode = #tpu.pipeline_mode<synchronous>, transform_indices = @transform_4, window_bounds = array<i64: 1, 32>}, {pipeline_mode = #tpu.pipeline_mode<synchronous>, transform_indices = @transform_5, window_bounds = array<i64: 1, 32>}, {pipeline_mode = #tpu.pipeline_mode<synchronous>, transform_indices = @transform_6, window_bounds = array<i64: 1, 32>}, {transform_indices = @transform_7, window_bounds = array<i64: 8, 32>}]} {
    %c0_i32 = arith.constant 0 : i32
    %0 = arith.cmpi eq, %arg1, %c0_i32 : i32
    %1 = arith.extui %0 : i1 to i32
    %c0_i32_0 = arith.constant 0 : i32
    %2 = arith.cmpi ne, %1, %c0_i32_0 : i32
    scf.if %2 {
      %cst_17 = arith.constant 0.000000e+00 : f32
      %18 = vector.broadcast %cst_17 : f32 to vector<8x32xf32>
      %c0_18 = arith.constant 0 : index
      %c0_19 = arith.constant 0 : index
      %19 = vector.load %arg10[%c0_18, %c0_19] : memref<8x32xf32, #tpu.memory_space<vmem>>, vector<8x32xf32>
      tpu.vector_store %arg10[%c0_18, %c0_19], %18 {strides = array<i32>} : memref<8x32xf32, #tpu.memory_space<vmem>>, vector<8x32xf32>,
      %cst_20 = arith.constant 0.000000e+00 : f32
      %20 = vector.broadcast %cst_20 : f32 to vector<8x32xf32>
      %c0_21 = arith.constant 0 : index
      %c0_22 = arith.constant 0 : index
      %21 = vector.load %arg11[%c0_21, %c0_22] : memref<8x32xf32, #tpu.memory_space<vmem>>, vector<8x32xf32>
      tpu.vector_store %arg11[%c0_21, %c0_22], %20 {strides = array<i32>} : memref<8x32xf32, #tpu.memory_space<vmem>>, vector<8x32xf32>,
    } else {
    }
    %c0 = arith.constant 0 : index
    %c0_1 = arith.constant 0 : index
    %3 = vector.load %arg2[%c0, %c0_1] : memref<8x32xf32, #tpu.memory_space<vmem>>, vector<8x32xf32>
    %4 = arith.truncf %3 : vector<8x32xf32> to vector<8x32xbf16>
    %c0_2 = arith.constant 0 : index
    %c0_3 = arith.constant 0 : index
    %5 = vector.load %arg10[%c0_2, %c0_3] : memref<8x32xf32, #tpu.memory_space<vmem>>, vector<8x32xf32>
    %c0_4 = arith.constant 0 : index
    %c0_5 = arith.constant 0 : index
    %6 = vector.load %arg3[%c0_4, %c0_5] : memref<32x32xbf16, #tpu.memory_space<vmem>>, vector<32x32xbf16>
    %cst = arith.constant dense<0.000000e+00> : vector<8x32xf32>
    %7 = tpu.matmul %4, %6, %cst {dimension_numbers = #tpu.dot_dimension_numbers<[1], [0], [0], [1], [0, 0, 1, 1], [], []>} : vector<8x32xbf16>, vector<32x32xbf16>, vector<8x32xf32> -> vector<8x32xf32>
    %8 = arith.addf %5, %7 : vector<8x32xf32>
    %c0_6 = arith.constant 0 : index
    %c0_7 = arith.constant 0 : index
    %9 = vector.load %arg10[%c0_6, %c0_7] : memref<8x32xf32, #tpu.memory_space<vmem>>, vector<8x32xf32>
    tpu.vector_store %arg10[%c0_6, %c0_7], %8 {strides = array<i32>} : memref<8x32xf32, #tpu.memory_space<vmem>>, vector<8x32xf32>,
    %c0_8 = arith.constant 0 : index
    %c0_9 = arith.constant 0 : index
    %10 = vector.load %arg11[%c0_8, %c0_9] : memref<8x32xf32, #tpu.memory_space<vmem>>, vector<8x32xf32>
    %c0_10 = arith.constant 0 : index
    %c0_11 = arith.constant 0 : index
    %11 = vector.load %arg4[%c0_10, %c0_11] : memref<32x32xbf16, #tpu.memory_space<vmem>>, vector<32x32xbf16>
    %cst_12 = arith.constant dense<0.000000e+00> : vector<8x32xf32>
    %12 = tpu.matmul %4, %11, %cst_12 {dimension_numbers = #tpu.dot_dimension_numbers<[1], [0], [0], [1], [0, 0, 1, 1], [], []>} : vector<8x32xbf16>, vector<32x32xbf16>, vector<8x32xf32> -> vector<8x32xf32>
    %13 = arith.addf %10, %12 : vector<8x32xf32>
    %c0_13 = arith.constant 0 : index
    %c0_14 = arith.constant 0 : index
    %14 = vector.load %arg11[%c0_13, %c0_14] : memref<8x32xf32, #tpu.memory_space<vmem>>, vector<8x32xf32>
    tpu.vector_store %arg11[%c0_13, %c0_14], %13 {strides = array<i32>} : memref<8x32xf32, #tpu.memory_space<vmem>>, vector<8x32xf32>,
    %c0_i32_15 = arith.constant 0 : i32
    %15 = arith.cmpi eq, %arg1, %c0_i32_15 : i32
    %16 = arith.extui %15 : i1 to i32
    %c0_i32_16 = arith.constant 0 : i32
    %17 = arith.cmpi ne, %16, %c0_i32_16 : i32
    scf.if %17 {
      %c0_17 = arith.constant 0 : index
      %c0_18 = arith.constant 0 : index
      %18 = vector.load %arg10[%c0_17, %c0_18] : memref<8x32xf32, #tpu.memory_space<vmem>>, vector<8x32xf32>
      %c0_19 = arith.constant 0 : index
      %c0_20 = arith.constant 0 : index
      %19 = vector.load %arg5[%c0_19, %c0_20] : memref<1x32xf32, #tpu.memory_space<vmem>>, vector<1x32xf32>
      %20 = vector.broadcast %19 : vector<1x32xf32> to vector<8x32xf32>
      %21 = arith.addf %18, %20 : vector<8x32xf32>
      %22 = arith.negf %21 : vector<8x32xf32>
      %23 = math.exp %22 : vector<8x32xf32>
      %cst_21 = arith.constant 1.000000e+00 : f32
      %24 = vector.broadcast %cst_21 : f32 to vector<8x32xf32>
      %25 = arith.addf %24, %23 : vector<8x32xf32>
      %26 = arith.divf %24, %25 : vector<8x32xf32>
      %c0_22 = arith.constant 0 : index
      %c0_23 = arith.constant 0 : index
      %27 = vector.load %arg11[%c0_22, %c0_23] : memref<8x32xf32, #tpu.memory_space<vmem>>, vector<8x32xf32>
      %c0_24 = arith.constant 0 : index
      %c0_25 = arith.constant 0 : index
      %28 = vector.load %arg6[%c0_24, %c0_25] : memref<1x32xf32, #tpu.memory_space<vmem>>, vector<1x32xf32>
      %29 = vector.broadcast %28 : vector<1x32xf32> to vector<8x32xf32>
      %30 = arith.addf %27, %29 : vector<8x32xf32>
      %31 = arith.mulf %26, %30 : vector<8x32xf32>
      %cst_26 = arith.constant dense<0.000000e+00> : vector<8xf32>
      %32 = vector.multi_reduction <add>, %31, %cst_26 [1] : vector<8x32xf32> to vector<8xf32>
      %33 = vector.shape_cast %32 : vector<8xf32> to vector<8x1xf32>
      %cst_27 = arith.constant 3.200000e+01 : f32
      %34 = vector.broadcast %cst_27 : f32 to vector<8x1xf32>
      %35 = arith.divf %33, %34 : vector<8x1xf32>
      %36 = vector.broadcast %35 : vector<8x1xf32> to vector<8x32xf32>
      %37 = arith.subf %31, %36 : vector<8x32xf32>
      %38 = arith.mulf %37, %37 : vector<8x32xf32>
      %cst_28 = arith.constant dense<0.000000e+00> : vector<8xf32>
      %39 = vector.multi_reduction <add>, %38, %cst_28 [1] : vector<8x32xf32> to vector<8xf32>
      %40 = vector.shape_cast %39 : vector<8xf32> to vector<8x1xf32>
      %cst_29 = arith.constant 3.200000e+01 : f32
      %41 = vector.broadcast %cst_29 : f32 to vector<8x1xf32>
      %42 = arith.divf %40, %41 : vector<8x1xf32>
      %cst_30 = arith.constant 9.99999974E-6 : f32
      %43 = vector.broadcast %cst_30 : f32 to vector<8x1xf32>
      %44 = arith.addf %42, %43 : vector<8x1xf32>
      %45 = math.rsqrt %44 : vector<8x1xf32>
      %46 = vector.broadcast %45 : vector<8x1xf32> to vector<8x32xf32>
      %47 = arith.mulf %37, %46 : vector<8x32xf32>
      %c0_31 = arith.constant 0 : index
      %c0_32 = arith.constant 0 : index
      %48 = vector.load %arg7[%c0_31, %c0_32] : memref<1x32xf32, #tpu.memory_space<vmem>>, vector<1x32xf32>
      %49 = vector.broadcast %48 : vector<1x32xf32> to vector<8x32xf32>
      %50 = arith.mulf %47, %49 : vector<8x32xf32>
      %c0_33 = arith.constant 0 : index
      %c0_34 = arith.constant 0 : index
      %51 = vector.load %arg8[%c0_33, %c0_34] : memref<1x32xf32, #tpu.memory_space<vmem>>, vector<1x32xf32>
      %52 = vector.broadcast %51 : vector<1x32xf32> to vector<8x32xf32>
      %53 = arith.addf %50, %52 : vector<8x32xf32>
      %c0_35 = arith.constant 0 : index
      %c0_36 = arith.constant 0 : index
      %54 = vector.load %arg9[%c0_35, %c0_36] : memref<8x32xf32, #tpu.memory_space<vmem>>, vector<8x32xf32>
      tpu.vector_store %arg9[%c0_35, %c0_36], %53 {strides = array<i32>} : memref<8x32xf32, #tpu.memory_space<vmem>>, vector<8x32xf32>,
    } else {
    }
    return
  }
  func.func @transform_0(%arg0: i32, %arg1: i32) -> (i32, i32) {
    %c0_i32 = arith.constant 0 : i32
    return %arg0, %arg1 : i32, i32
  }
  func.func @transform_1(%arg0: i32, %arg1: i32) -> (i32, i32) {
    %c0_i32 = arith.constant 0 : i32
    %c0_i32_0 = arith.constant 0 : i32
    return %arg1, %c0_i32 : i32, i32
  }
  func.func @transform_2(%arg0: i32, %arg1: i32) -> (i32, i32) {
    %c0_i32 = arith.constant 0 : i32
    %c0_i32_0 = arith.constant 0 : i32
    return %arg1, %c0_i32 : i32, i32
  }
  func.func @transform_3(%arg0: i32, %arg1: i32) -> (i32, i32) {
    %c0_i32 = arith.constant 0 : i32
    %c0_i32_0 = arith.constant 0 : i32
    %c0_i32_1 = arith.constant 0 : i32
    return %c0_i32, %c0_i32_0 : i32, i32
  }
  func.func @transform_4(%arg0: i32, %arg1: i32) -> (i32, i32) {
    %c0_i32 = arith.constant 0 : i32
    %c0_i32_0 = arith.constant 0 : i32
    %c0_i32_1 = arith.constant 0 : i32
    return %c0_i32, %c0_i32_0 : i32, i32
  }
  func.func @transform_5(%arg0: i32, %arg1: i32) -> (i32, i32) {
    %c0_i32 = arith.constant 0 : i32
    %c0_i32_0 = arith.constant 0 : i32
    %c0_i32_1 = arith.constant 0 : i32
    return %c0_i32, %c0_i32_0 : i32, i32
  }
  func.func @transform_6(%arg0: i32, %arg1: i32) -> (i32, i32) {
    %c0_i32 = arith.constant 0 : i32
    %c0_i32_0 = arith.constant 0 : i32
    %c0_i32_1 = arith.constant 0 : i32
    return %c0_i32, %c0_i32_0 : i32, i32
  }
  func.func @transform_7(%arg0: i32, %arg1: i32) -> (i32, i32) {
    %c0_i32 = arith.constant 0 : i32
    %c0_i32_0 = arith.constant 0 : i32
    return %arg0, %c0_i32 : i32, i32
  }
}

module attributes {stable_mosaic.version = 11 : i64} {
  func.func @_state_coupling_kernel(%arg0: i32, %arg1: i32, %arg2: memref<8x32xf32, #tpu.memory_space<vmem>>, %arg3: memref<32x32xbf16, #tpu.memory_space<vmem>>, %arg4: memref<32x32xbf16, #tpu.memory_space<vmem>>, %arg5: memref<1x32xf32, #tpu.memory_space<vmem>>, %arg6: memref<1x32xf32, #tpu.memory_space<vmem>>, %arg7: memref<1x32xf32, #tpu.memory_space<vmem>>, %arg8: memref<1x32xf32, #tpu.memory_space<vmem>>, %arg9: memref<8x32xf32, #tpu.memory_space<vmem>>, %arg10: memref<8x32xf32, #tpu.memory_space<vmem>>, %arg11: memref<8x32xf32, #tpu.memory_space<vmem>>) attributes {dimension_semantics = [#tpu.dimension_semantics<parallel>, #tpu.dimension_semantics<arbitrary>], iteration_bounds = array<i64: 2, 1>, scalar_prefetch = 0 : i64, scratch_operands = 2 : i64, tpu.core_type = #tpu.core_type<tc>, window_params = [{transform_indices = @transform_0, window_bounds = array<i64: 8, 32>}, {transform_indices = @transform_1, window_bounds = array<i64: 32, 32>}, {transform_indices = @transform_2, window_bounds = array<i64: 32, 32>}, {pipeline_mode = #tpu.pipeline_mode<synchronous>, transform_indices = @transform_3, window_bounds = array<i64: 1, 32>}, {pipeline_mode = #tpu.pipeline_mode<synchronous>, transform_indices = @transform_4, window_bounds = array<i64: 1, 32>}, {pipeline_mode = #tpu.pipeline_mode<synchronous>, transform_indices = @transform_5, window_bounds = array<i64: 1, 32>}, {pipeline_mode = #tpu.pipeline_mode<synchronous>, transform_indices = @transform_6, window_bounds = array<i64: 1, 32>}, {transform_indices = @transform_7, window_bounds = array<i64: 8, 32>}]} {
    %c0_i32 = arith.constant 0 : i32
    %0 = arith.cmpi eq, %arg1, %c0_i32 : i32
    %1 = arith.extui %0 : i1 to i32
    %c0_i32_0 = arith.constant 0 : i32
    %2 = arith.cmpi ne, %1, %c0_i32_0 : i32
    scf.if %2 {
      %cst_17 = arith.constant 0.000000e+00 : f32
      %18 = vector.broadcast %cst_17 : f32 to vector<8x32xf32>
      %c0_18 = arith.constant 0 : index
      %c0_19 = arith.constant 0 : index
      %19 = vector.load %arg10[%c0_18, %c0_19] : memref<8x32xf32, #tpu.memory_space<vmem>>, vector<8x32xf32>
      tpu.vector_store %arg10[%c0_18, %c0_19], %18 {strides = array<i32>} : memref<8x32xf32, #tpu.memory_space<vmem>>, vector<8x32xf32>,
      %cst_20 = arith.constant 0.000000e+00 : f32
      %20 = vector.broadcast %cst_20 : f32 to vector<8x32xf32>
      %c0_21 = arith.constant 0 : index
      %c0_22 = arith.constant 0 : index
      %21 = vector.load %arg11[%c0_21, %c0_22] : memref<8x32xf32, #tpu.memory_space<vmem>>, vector<8x32xf32>
      tpu.vector_store %arg11[%c0_21, %c0_22], %20 {strides = array<i32>} : memref<8x32xf32, #tpu.memory_space<vmem>>, vector<8x32xf32>,
    } else {
    }
    %c0 = arith.constant 0 : index
    %c0_1 = arith.constant 0 : index
    %3 = vector.load %arg2[%c0, %c0_1] : memref<8x32xf32, #tpu.memory_space<vmem>>, vector<8x32xf32>
    %4 = arith.truncf %3 : vector<8x32xf32> to vector<8x32xbf16>
    %c0_2 = arith.constant 0 : index
    %c0_3 = arith.constant 0 : index
    %5 = vector.load %arg10[%c0_2, %c0_3] : memref<8x32xf32, #tpu.memory_space<vmem>>, vector<8x32xf32>
    %c0_4 = arith.constant 0 : index
    %c0_5 = arith.constant 0 : index
    %6 = vector.load %arg3[%c0_4, %c0_5] : memref<32x32xbf16, #tpu.memory_space<vmem>>, vector<32x32xbf16>
    %cst = arith.constant dense<0.000000e+00> : vector<8x32xf32>
    %7 = tpu.matmul %4, %6, %cst {dimension_numbers = #tpu.dot_dimension_numbers<[1], [0], [0], [1], [0, 0, 1, 1], [], []>} : vector<8x32xbf16>, vector<32x32xbf16>, vector<8x32xf32> -> vector<8x32xf32>
    %8 = arith.addf %5, %7 : vector<8x32xf32>
    %c0_6 = arith.constant 0 : index
    %c0_7 = arith.constant 0 : index
    %9 = vector.load %arg10[%c0_6, %c0_7] : memref<8x32xf32, #tpu.memory_space<vmem>>, vector<8x32xf32>
    tpu.vector_store %arg10[%c0_6, %c0_7], %8 {strides = array<i32>} : memref<8x32xf32, #tpu.memory_space<vmem>>, vector<8x32xf32>,
    %c0_8 = arith.constant 0 : index
    %c0_9 = arith.constant 0 : index
    %10 = vector.load %arg11[%c0_8, %c0_9] : memref<8x32xf32, #tpu.memory_space<vmem>>, vector<8x32xf32>
    %c0_10 = arith.constant 0 : index
    %c0_11 = arith.constant 0 : index
    %11 = vector.load %arg4[%c0_10, %c0_11] : memref<32x32xbf16, #tpu.memory_space<vmem>>, vector<32x32xbf16>
    %cst_12 = arith.constant dense<0.000000e+00> : vector<8x32xf32>
    %12 = tpu.matmul %4, %11, %cst_12 {dimension_numbers = #tpu.dot_dimension_numbers<[1], [0], [0], [1], [0, 0, 1, 1], [], []>} : vector<8x32xbf16>, vector<32x32xbf16>, vector<8x32xf32> -> vector<8x32xf32>
    %13 = arith.addf %10, %12 : vector<8x32xf32>
    %c0_13 = arith.constant 0 : index
    %c0_14 = arith.constant 0 : index
    %14 = vector.load %arg11[%c0_13, %c0_14] : memref<8x32xf32, #tpu.memory_space<vmem>>, vector<8x32xf32>
    tpu.vector_store %arg11[%c0_13, %c0_14], %13 {strides = array<i32>} : memref<8x32xf32, #tpu.memory_space<vmem>>, vector<8x32xf32>,
    %c0_i32_15 = arith.constant 0 : i32
    %15 = arith.cmpi eq, %arg1, %c0_i32_15 : i32
    %16 = arith.extui %15 : i1 to i32
    %c0_i32_16 = arith.constant 0 : i32
    %17 = arith.cmpi ne, %16, %c0_i32_16 : i32
    scf.if %17 {
      %c0_17 = arith.constant 0 : index
      %c0_18 = arith.constant 0 : index
      %18 = vector.load %arg10[%c0_17, %c0_18] : memref<8x32xf32, #tpu.memory_space<vmem>>, vector<8x32xf32>
      %c0_19 = arith.constant 0 : index
      %c0_20 = arith.constant 0 : index
      %19 = vector.load %arg5[%c0_19, %c0_20] : memref<1x32xf32, #tpu.memory_space<vmem>>, vector<1x32xf32>
      %20 = vector.broadcast %19 : vector<1x32xf32> to vector<8x32xf32>
      %21 = arith.addf %18, %20 : vector<8x32xf32>
      %22 = arith.negf %21 : vector<8x32xf32>
      %23 = math.exp %22 : vector<8x32xf32>
      %cst_21 = arith.constant 1.000000e+00 : f32
      %24 = vector.broadcast %cst_21 : f32 to vector<8x32xf32>
      %25 = arith.addf %24, %23 : vector<8x32xf32>
      %26 = arith.divf %24, %25 : vector<8x32xf32>
      %c0_22 = arith.constant 0 : index
      %c0_23 = arith.constant 0 : index
      %27 = vector.load %arg11[%c0_22, %c0_23] : memref<8x32xf32, #tpu.memory_space<vmem>>, vector<8x32xf32>
      %c0_24 = arith.constant 0 : index
      %c0_25 = arith.constant 0 : index
      %28 = vector.load %arg6[%c0_24, %c0_25] : memref<1x32xf32, #tpu.memory_space<vmem>>, vector<1x32xf32>
      %29 = vector.broadcast %28 : vector<1x32xf32> to vector<8x32xf32>
      %30 = arith.addf %27, %29 : vector<8x32xf32>
      %31 = arith.mulf %26, %30 : vector<8x32xf32>
      %cst_26 = arith.constant dense<0.000000e+00> : vector<8xf32>
      %32 = vector.multi_reduction <add>, %31, %cst_26 [1] : vector<8x32xf32> to vector<8xf32>
      %33 = vector.shape_cast %32 : vector<8xf32> to vector<8x1xf32>
      %cst_27 = arith.constant 3.200000e+01 : f32
      %34 = vector.broadcast %cst_27 : f32 to vector<8x1xf32>
      %35 = arith.divf %33, %34 : vector<8x1xf32>
      %36 = vector.broadcast %35 : vector<8x1xf32> to vector<8x32xf32>
      %37 = arith.subf %31, %36 : vector<8x32xf32>
      %38 = arith.mulf %37, %37 : vector<8x32xf32>
      %cst_28 = arith.constant dense<0.000000e+00> : vector<8xf32>
      %39 = vector.multi_reduction <add>, %38, %cst_28 [1] : vector<8x32xf32> to vector<8xf32>
      %40 = vector.shape_cast %39 : vector<8xf32> to vector<8x1xf32>
      %cst_29 = arith.constant 3.200000e+01 : f32
      %41 = vector.broadcast %cst_29 : f32 to vector<8x1xf32>
      %42 = arith.divf %40, %41 : vector<8x1xf32>
      %cst_30 = arith.constant 9.99999974E-6 : f32
      %43 = vector.broadcast %cst_30 : f32 to vector<8x1xf32>
      %44 = arith.addf %42, %43 : vector<8x1xf32>
      %45 = math.rsqrt %44 : vector<8x1xf32>
      %46 = vector.broadcast %45 : vector<8x1xf32> to vector<8x32xf32>
      %47 = arith.mulf %37, %46 : vector<8x32xf32>
      %c0_31 = arith.constant 0 : index
      %c0_32 = arith.constant 0 : index
      %48 = vector.load %arg7[%c0_31, %c0_32] : memref<1x32xf32, #tpu.memory_space<vmem>>, vector<1x32xf32>
      %49 = vector.broadcast %48 : vector<1x32xf32> to vector<8x32xf32>
      %50 = arith.mulf %47, %49 : vector<8x32xf32>
      %c0_33 = arith.constant 0 : index
      %c0_34 = arith.constant 0 : index
      %51 = vector.load %arg8[%c0_33, %c0_34] : memref<1x32xf32, #tpu.memory_space<vmem>>, vector<1x32xf32>
      %52 = vector.broadcast %51 : vector<1x32xf32> to vector<8x32xf32>
      %53 = arith.addf %50, %52 : vector<8x32xf32>
      %c0_35 = arith.constant 0 : index
      %c0_36 = arith.constant 0 : index
      %54 = vector.load %arg9[%c0_35, %c0_36] : memref<8x32xf32, #tpu.memory_space<vmem>>, vector<8x32xf32>
      tpu.vector_store %arg9[%c0_35, %c0_36], %53 {strides = array<i32>} : memref<8x32xf32, #tpu.memory_space<vmem>>, vector<8x32xf32>,
    } else {
    }
    return
  }
  func.func @transform_0(%arg0: i32, %arg1: i32) -> (i32, i32) {
    %c0_i32 = arith.constant 0 : i32
    return %arg0, %arg1 : i32, i32
  }
  func.func @transform_1(%arg0: i32, %arg1: i32) -> (i32, i32) {
    %c0_i32 = arith.constant 0 : i32
    %c0_i32_0 = arith.constant 0 : i32
    return %arg1, %c0_i32 : i32, i32
  }
  func.func @transform_2(%arg0: i32, %arg1: i32) -> (i32, i32) {
    %c0_i32 = arith.constant 0 : i32
    %c0_i32_0 = arith.constant 0 : i32
    return %arg1, %c0_i32 : i32, i32
  }
  func.func @transform_3(%arg0: i32, %arg1: i32) -> (i32, i32) {
    %c0_i32 = arith.constant 0 : i32
    %c0_i32_0 = arith.constant 0 : i32
    %c0_i32_1 = arith.constant 0 : i32
    return %c0_i32, %c0_i32_0 : i32, i32
  }
  func.func @transform_4(%arg0: i32, %arg1: i32) -> (i32, i32) {
    %c0_i32 = arith.constant 0 : i32
    %c0_i32_0 = arith.constant 0 : i32
    %c0_i32_1 = arith.constant 0 : i32
    return %c0_i32, %c0_i32_0 : i32, i32
  }
  func.func @transform_5(%arg0: i32, %arg1: i32) -> (i32, i32) {
    %c0_i32 = arith.constant 0 : i32
    %c0_i32_0 = arith.constant 0 : i32
    %c0_i32_1 = arith.constant 0 : i32
    return %c0_i32, %c0_i32_0 : i32, i32
  }
  func.func @transform_6(%arg0: i32, %arg1: i32) -> (i32, i32) {
    %c0_i32 = arith.constant 0 : i32
    %c0_i32_0 = arith.constant 0 : i32
    %c0_i32_1 = arith.constant 0 : i32
    return %c0_i32, %c0_i32_0 : i32, i32
  }
  func.func @transform_7(%arg0: i32, %arg1: i32) -> (i32, i32) {
    %c0_i32 = arith.constant 0 : i32
    %c0_i32_0 = arith.constant 0 : i32
    return %arg0, %c0_i32 : i32, i32
  }
}

</mosaic_0001>

<bundles_post_ra>
// kernel: _state_coupling_call.1
= control target key start
LH: loop header
LB: loop body
LE: loop exit
PB: predicated region body
PF: predicated region fallthrough
CT: control target
= control target key end

     0   :  { %s1165_s0 = inlined_call_operand.hbm [shape: f32[16,32], index: 0, kind: input, shape index: {}]   ;;  %s1166_s1 = inlined_call_operand.hbm [shape: bf16[32,32], index: 1, kind: input, shape index: {}]   ;;  %s1167_s2 = inlined_call_operand.hbm [shape: bf16[32,32], index: 2, kind: input, shape index: {}]   ;;  %s1168_s3 = inlined_call_operand.vmem [shape: f32[1,32], index: 3, kind: input, shape index: {}]   ;;  %s1169_s4 = inlined_call_operand.vmem [shape: f32[1,32], index: 4, kind: input, shape index: {}]   ;;  %s1170_s5 = inlined_call_operand.vmem [shape: f32[1,32], index: 5, kind: input, shape index: {}]   ;;  %s1171_s6 = inlined_call_operand.vmem [shape: f32[1,32], index: 6, kind: input, shape index: {}]   ;;  %s1172_s7 = inlined_call_operand.hbm [shape: f32[16,32], index: 7, kind: output, shape index: {}]  }
   0x1   :  { %1173 = sst [smem:[#allocation14_spill]] %s1166_s1 }
   0x2   :  { %12 = vsyncpa [#allocation5], 0 }
   0x3   :  { %14 = vsyncpa [#allocation5 + $0x1], 0 }
   0x4   :  { %15 = vsyncpa [#allocation8], 0 }
   0x5   :  { %16 = vsyncpa [#allocation6], 0 }
   0x6   :  { %18 = vsyncpa [#allocation6 + $0x1], 0  ;;  %s996_s24 = smov 0   ;;  %s998_s25 = smov 0  }
   0x7   :  { %s1000_s26 = smov 0   ;;  %s1002_s27 = smov 0  }
   0x8   :  { %s1004_s28 = smov 0   ;;  %s1006_s29 = smov 0  }
   0x9 LB: > { %s633_s30 = sadd.s32 4294967295, %s948_s29   ;;  %p635_p0 = scmp.ge.s32.totalorder %s948_s29, 1  ;;  %s948_s29 = sphi %s1006_s29, %s24_s29   ;;  %s944_s28 = sphi %s1004_s28, %s1184_s28   ;;  %s940_s27 = sphi %s1002_s27, %s1183_s27   ;;  %s936_s26 = sphi %s1000_s26, %s1182_s26   ;;  %s932_s25 = sphi %s998_s25, %s1181_s25   ;;  %s928_s24 = sphi %s996_s24, %s1180_s24  }
   0xa   : > { %p1030_p1 = scmp.eq.s32.totalorder %s633_s30, 0  ;;  %p231_p2 = scmp.lt.s32.totalorder %s948_s29, 3 }
   0xb   : > { %s1175_s1 = sld [smem:[#allocation14_spill]]  ;;  %s950_s13 = smov [#allocation7]  }
   0xc   : > { %p1038_p3 = pnand %p635_p0, %p231_p2  ;;  %s247_s14 = sshll.u32 %s950_s13, 4  ;;  %s248_s14 = int_to_ptr.vmem [resolvable:$true] %s247_s14 }
   0xd   : > { %p638_p6 = scmp.ge.s32.totalorder %s948_s29, 2  ;;  %s262_s17 = sshll.u32 %s1167_s2, 4  ;;  %s263_s17 = int_to_ptr.hbm [resolvable:$true] %s262_s17 }
   0xe   : > { %p685_p4 = pneg %p1038_p3  ;;  %s951_s18 = smov 64  }
   0xf   : > { %s952_s19 = smov 4   ;;  %s953_s20 = smov [#allocation9]  }
  0x10   : > { %p686_p5 = pnand %p685_p4, %p1030_p1  ;;  %s264_s21 = sshll.u32 %s953_s20, 4  ;;  %s265_s21 = int_to_ptr.vmem [resolvable:$true] %s264_s21 }
  0x11   : > { %s245_s11 = sshll.u32 %s1175_s1, 4  ;;  %s36_s22 = sadd.s32 1, %s944_s28  ;;  %s246_s11 = int_to_ptr.hbm [resolvable:$true] %s245_s11 }
  0x12   : > { %688 = dma.hbm_to_vmem [thread:$0]  (!%p686_p5), %s246_s11, 256, %s248_s14, [#allocation8], %s951_s18, %s951_s18, %s952_s19  }
  0x13   : > { %691 = dma.hbm_to_vmem [thread:$0]  (!%p686_p5), %s263_s17, 256, %s265_s21, [#allocation8], %s951_s18, %s951_s18, %s952_s19  }
  0x14   : > { %s634_s23 = sadd.s32 4294967294, %s948_s29   ;;  %p38_p7 = scmp.ge.s32.totalorder %s36_s22, 2 }
  0x15   : > { %s45_s9 = sadd.s32 1, %s936_s26  ;;  %p52_p8 = scmp.ne.s32.totalorder %s936_s26, %s932_s25 }
  0x16   : > { %s1186_s22 = smov (%p38_p7, %s36_s22), 0  ;;  %p53_p9 = scmp.eq.s32.totalorder %s948_s29, 0 }
  0x17   : > { %p58_p10 = scmp.ne.s32.totalorder %s932_s25, %s928_s24  ;;  %s40_s10 = ssub.s32 %s944_s28, %s1186_s22 }
  0x18   : > { %p218_p11 = scmp.eq.s32.totalorder %s633_s30, 1  ;;  %p43_p12 = scmp.eq.s32.totalorder %s40_s10, 0 }
  0x19   : > { %p1066_p13 = por %p1030_p1, %p58_p10  ;;  %p224_p2 = scmp.eq.s32.totalorder %s634_s23, 1 }
  0x1a   : > { %p1070_p0 = por %p218_p11, %p52_p8  ;;  %p54_p4 = por %p53_p9, %p52_p8 }
  0x1b   : > { %s1075_s14 = scalar_select %p43_p12, %s936_s26, %s45_s9  }
  0x1c   : > { %p1077_p5 = por %p224_p2, %p58_p10  ;;  %s290_s16 = sand.u32 1, %s936_s26  }
  0x1d   : > { %s640_s30 = sshll.u32 %s944_s28, 3  ;;  %p702_p7 = scmp.lt.s32.totalorder %s948_s29, 2 }
  0x1e   : > { %s639_s17 = sshll.u32 %s290_s16, 3  ;;  %s299_s20 = scalar_lea.hbm %s1165_s0, %s640_s30 }
  0x1f   : > { %s301_s21 = sshll.u32 %s299_s20, 4  ;;  %s294_s10 = scalar_lea.vmem [#allocation4], %s639_s17  ;;  %s302_s21 = int_to_ptr.hbm [resolvable:$true] %s301_s21 }
  0x20   : > { %s303_s1 = sshll.u32 %s294_s10, 4  ;;  %p693_p11 = pnand %p702_p7, %p54_p4  ;;  %s304_s1 = int_to_ptr.vmem [resolvable:$true] %s303_s1 }
  0x21   : > { %s291_s23 = scalar_lea.sflag [#allocation5], %s290_s16  ;;  %312 = sbr.rel (%p1038_p3) target bundleno = 488 (0x1e8), region = 48 }
  0x22   : > { %695 = dma.hbm_to_vmem [thread:$0]  (!%p693_p11), %s302_s21, 128, %s304_s1, %s291_s23  }
  0x23   : > { %s1090_s9 = sand.u32 (!%p1038_p3), 1, %s932_s25  }
  0x24   : > { %s642_s18 = sshll.u32 (!%p1038_p3), %s1090_s9, 3  ;;  %s315_s30 = scalar_lea.sflag (!%p1038_p3), [#allocation5], %s1090_s9 }
  0x25   : > { %s318_s17 = scalar_lea.vmem (!%p1038_p3), [#allocation4], %s642_s18 }
  0x26   : > { %915 = dma.done.wait (%p1066_p13), %s315_s30, 128  }
  0x27   : > { %917 = vsyncadd (%p1066_p13), %s315_s30, 4294967168 }
  0x28   : > { %919 = dma.done.wait (%p1030_p1), [#allocation8], 512  }
  0x29   : > { %921 = vsyncadd (%p1030_p1), [#allocation8], 4294966784  ;;  %vm367_vm0 = vcmask 261120   ;;  %v954_v0 = vmov 0.0   ;;  %v670_v1 = vld [vmem:[#allocation7 + $0x8] sm:$0xff]  ;;  %v669_v2 = vld [vmem:[#allocation7] sm:$0xff] }
  0x2a   : > { %368 = vst.msk [vmem:[#allocation2] sm:$0xff] %vm367_vm0, %v954_v0  ;;  %v370_v3 = vld [vmem:[%s318_s17] sm:$0xff]  ;;  %399 = vmatpush.bf16.msra.mxu0 %v670_v1  ;;  %v760_v13 = vld [vmem:[%s1168_s3] ss:$0 sm:$0xff]  ;;  %v955_v36 = vmov 32.0   ;;  %s666_s16 = sshll.u32 %s940_s27, 3 }
  0x2b   : > { %369 = vst.msk [vmem:[#allocation3] sm:$0xff] %vm367_vm0, %v954_v0  ;;  %v672_v4 = vld [vmem:[#allocation9 + $0x8] sm:$0xff]  ;;  %v671_v5 = vld [vmem:[#allocation9] sm:$0xff]  ;;  %v371_v6 = vpack.c.bf16 %v370_v3, %v370_v3  ;;  %v761_v24 = vld [vmem:[%s1169_s4] ss:$0 sm:$0xff]  ;;  %s526_s23 = scalar_lea.hbm %s1172_s7, %s666_s16  ;;  %s359_s27 = scalar_lea.vmem [#allocation10], %s642_s18 }
  0x2c   : > { %431 = vmatpush.bf16.msra.mxu1 %v672_v4  ;;  %v762_v57 = vld [vmem:[%s1170_s5] ss:$0 sm:$0xff]  ;;  %s528_s1 = sshll.u32 %s359_s27, 4  ;;  %s530_s8 = sshll.u32 %s526_s23, 4  ;;  %s529_s1 = int_to_ptr.vmem [resolvable:$true] %s528_s1  ;;  %s531_s8 = int_to_ptr.hbm [resolvable:$true] %s530_s8 }
  0x2d   : > { %v763_v60 = vld [vmem:[%s1171_s6] ss:$0 sm:$0xff]  ;;  %s516_s12 = scalar_lea.sflag [#allocation6], %s1090_s9  ;;  %s876_s11 = sshra.s32 %s531_s8, 4  ;;  %s877_s11 = int_to_ptr.hbm [resolvable:$true] %s876_s11 }
  0x2e   : > { %400 = vmatpush.bf16.msra.mxu0 %v669_v2  ;;  %s878_s16 = scalar_lea.hbm %s877_s11, 8  ;;  %s882_s18 = scalar_lea.hbm %s1172_s7, 16 }
  0x2f   : > { %p879_p1 = scmp.ne.s32.totalorder %s877_s11, %s878_s16  ;;  %p883_p9 = scmp.lt.s32.totalorder %s877_s11, %s1172_s7 }
  0x30   : > { %432 = vmatpush.bf16.msra.mxu1 %v671_v5  ;;  %p884_p10 = scmp.lt.s32.totalorder %s882_s18, %s878_s16 }
  0x31   : > { %654 = vmatmul.msk.bf16.vlgmr.msra.gmra.mxu0 %vm367_vm0, %v371_v6  ;;  %v372_v7 = vld [vmem:[#allocation2] sm:$0xff]  ;;  %p880_p3 = pnand %p879_p1, %p1070_p0 }
  0x32   : > { %v408_v8 = vld [vmem:[#allocation3] sm:$0xff]  ;;  %p885_p12 = por %p884_p10, %p883_p9 }
  0x33   : > { %663 = vmatmul.msk.bf16.vlgmr.msra.gmra.mxu1 %vm367_vm0, %v371_v6  ;;  %p881_p8 = pneg %p880_p3 }
  0x35   : > { %p886_p13 = pnand %p885_p12, %p881_p8 }
  0xae   : > { %v402_v9 = vpop.f32.mrf.mxu0 }
  0xaf   : > { %v406_v10 = vadd.f32 %v402_v9, %v372_v7 }
  0xb0   : > { %v434_v11 = vpop.f32.mrf.mxu1 }
  0xb1   : > { %v438_v12 = vadd.f32 %v434_v11, %v408_v8  ;;  %407 = vst.msk [vmem:[#allocation2] sm:$0xff] %vm367_vm0, %v406_v10 }
  0xb3   : > { %439 = vst.msk [vmem:[#allocation3] sm:$0xff] %vm367_vm0, %v438_v12 }
  0xb6   : > { %v404_v14 = vpop.f32.mrf.mxu0 }
  0xb8   : > { %v436_v15 = vpop.f32.mrf.mxu1  ;;  %v443_v16 = vld [vmem:[#allocation2] sm:$0xff] }
  0xb9   : > { %v448_v17 = vadd.f32 %v760_v13, %v443_v16 }
  0xba   : > { %v468_v26 = vld [vmem:[#allocation3] sm:$0xff] }
  0xbb   : > { %v664_v18 = vmul.f32 -1.442695, %v448_v17  ;;  %v473_v30 = vadd.f32 %v761_v24, %v468_v26 }
  0xbd   : > { %764 = vpow2.f32 %v664_v18 }
  0xc3   : > { %v765_v19 = vpop.eup %764 }
  0xc4   : > { %v452_v20 = vadd.f32 1.0, %v765_v19 }
  0xc6   : > { %766 = vrcp.f32 %v452_v20  ;;  %v464_v25 = vand.u32 2147483648, %v452_v20  ;;  %v462_v28 = vand.u32 2147483647, %v452_v20  ;;  %vm458_vm2 = vweird.f32 %v452_v20 }
  0xc7   : > { %768 = vrcp.f32 %v955_v36 }
  0xc8   : > { %v465_v31 = vor.u32 1.1754944e-38, %v464_v25  ;;  %vm463_vm4 = vcmp.eq.f32.partialorder %v462_v28, 8.507059e+37 }
  0xcc   : > { %v767_v21 = vpop.eup %766 }
  0xcd   : > { %v454_v22 = vmul.f32 %v767_v21, %v452_v20  ;;  %vm459_vm1 = vweird.f32 %v767_v21  ;;  %v769_v37 = vpop.eup %768 }
  0xce   : > { %vm460_vm3 = vmor %vm458_vm2, %vm459_vm1  ;;  %v479_v38 = vmul.f32 32.0, %v769_v37  ;;  %vm483_vm5 = vweird.f32 %v769_v37 }
  0xcf   : > { %v455_v23 = vsub.f32 1.0, %v454_v22 }
  0xd0   : > { %v480_v39 = vsub.f32 1.0, %v479_v38 }
  0xd1   : > { %v456_v27 = vmul.f32 %v767_v21, %v455_v23 }
  0xd2   : > { %v481_v40 = vmul.f32 %v769_v37, %v480_v39 }
  0xd3   : > { %v457_v29 = vadd.f32 %v767_v21, %v456_v27 }
  0xd4   : > { %v482_v41 = vadd.f32 %v769_v37, %v481_v40 }
  0xd5   : > { %v461_v32 = vsel %vm460_vm3, %v767_v21, %v457_v29 }
  0xd6   : > { %v466_v33 = vsel %vm463_vm4, %v465_v31, %v461_v32  ;;  %v484_v42 = vsel %vm483_vm5, %v769_v37, %v482_v41 }
  0xd7   : > { %v474_v34 = vmul.f32 %v473_v30, %v466_v33 }
  0xd9   : > { %v475_v35 = vsel %vm367_vm0, %v474_v34, 0.0 }
  0xda   : > { %476 = vadd.xlane.f32.xlu0 %v475_v35 }
 0x14d   : > { %v477_v43 = vpop.xlane.xlu0 %476 }
 0x14e   : > { %v485_v44 = vmul.f32 %v484_v42, %v477_v43 }
 0x150   : > { %v486_v45 = vsub.f32 %v474_v34, %v485_v44 }
 0x152   : > { %v487_v46 = vmul.f32 %v486_v45, %v486_v45 }
 0x154   : > { %v488_v47 = vsel %vm367_vm0, %v487_v46, 0.0 }
 0x155   : > { %489 = vadd.xlane.f32.xlu0 %v488_v47 }
 0x1c8   : > { %v490_v48 = vpop.xlane.xlu0 %489 }
 0x1c9   : > { %v491_v49 = vmul.f32 %v490_v48, %v484_v42 }
 0x1cb   : > { %v492_v50 = vadd.f32 1e-05, %v491_v49 }
 0x1cd   : > { %770 = vrsqrt.f32 %v492_v50  ;;  %vm499_vm7 = vweird.f32 %v492_v50 }
 0x1d3   : > { %v771_v51 = vpop.eup %770 }
 0x1d4   : > { %v494_v52 = vmul.f32 %v771_v51, %v492_v50  ;;  %vm500_vm6 = vweird.f32 %v771_v51 }
 0x1d5   : > { %vm501_vm8 = vmor %vm499_vm7, %vm500_vm6 }
 0x1d6   : > { %v495_v53 = vmul.f32 %v771_v51, %v494_v52 }
 0x1d8   : > { %v496_v54 = vmul.f32 0.5, %v495_v53 }
 0x1da   : > { %v497_v55 = vsub.f32 1.5, %v496_v54 }
 0x1dc   : > { %v498_v56 = vmul.f32 %v771_v51, %v497_v55 }
 0x1de   : > { %v502_v58 = vsel %vm501_vm8, %v771_v51, %v498_v56 }
 0x1df   : > { %v503_v59 = vmul.f32 %v502_v58, %v486_v45 }
 0x1e1   : > { %v508_v61 = vmul.f32 %v762_v57, %v503_v59 }
 0x1e3   : > { %v513_v62 = vadd.f32 %v763_v60, %v508_v61 }
 0x1e5   : > { %514 = vst.msk [vmem:[%s359_s27] sm:$0xff] %vm367_vm0, %v513_v62 }
 0x1e6   : > { %889 = shalt.err (!%p886_p13)
}
 0x1e7   : > { %683 = dma.vmem_to_hbm [thread:$0]  (%p1070_p0), %s529_s1, 128, %s531_s8, %s516_s12  }
 0x1e8 PF: > { %s542_s9 = sand.u32 1, %s928_s24   ;;  %p697_p2 = pnand %p638_p6, %p1077_p5 }
 0x1e9   : > { %s543_s23 = scalar_lea.sflag [#allocation6], %s542_s9 }
 0x1ea   : > { %p698_p4 = pneg %p697_p2 }
 0x1ec   : > { %923 = dma.done.wait (%p698_p4), %s543_s23, 128  }
 0x1ed   : > { %925 = vsyncadd (%p698_p4), %s543_s23, 4294967168  ;;  %s24_s29 = sadd.s32 1, %s948_s29   ;;  %s1180_s24 = smov %s932_s25 }
 0x1ee   : > { %p21_p7 = scmp.ge.s32.totalorder %s24_s29, 4   ;;  %s1181_s25 = smov %s936_s26 }
 0x1ef   : > { %s1182_s26 = smov %s1075_s14  ;;  %s1183_s27 = smov %s944_s28 }
 0x1f0   : > { %s1184_s28 = smov %s1186_s22  ;;  %23 = sbr.rel (!%p21_p7) target bundleno = 9 (0x9), region = 111 }
 0x1f5   :  { %549 = vsyncpa [#allocation5], 1 }
 0x1f6   :  { %551 = vsyncpa [#allocation5 + $0x1], 1 }
 0x1f7   :  { %552 = vsyncpa [#allocation8], 1 }
 0x1f8   :  { %553 = vsyncpa [#allocation6], 1 }
 0x1f9   :  { %555 = vsyncpa [#allocation6 + $0x1], 1 }

// kernel: _state_coupling_call.1
= control target key start
LH: loop header
LB: loop body
LE: loop exit
PB: predicated region body
PF: predicated region fallthrough
CT: control target
= control target key end

     0   :  { %s1165_s0 = inlined_call_operand.hbm [shape: f32[16,32], index: 0, kind: input, shape index: {}]   ;;  %s1166_s1 = inlined_call_operand.hbm [shape: bf16[32,32], index: 1, kind: input, shape index: {}]   ;;  %s1167_s2 = inlined_call_operand.hbm [shape: bf16[32,32], index: 2, kind: input, shape index: {}]   ;;  %s1168_s3 = inlined_call_operand.vmem [shape: f32[1,32], index: 3, kind: input, shape index: {}]   ;;  %s1169_s4 = inlined_call_operand.vmem [shape: f32[1,32], index: 4, kind: input, shape index: {}]   ;;  %s1170_s5 = inlined_call_operand.vmem [shape: f32[1,32], index: 5, kind: input, shape index: {}]   ;;  %s1171_s6 = inlined_call_operand.vmem [shape: f32[1,32], index: 6, kind: input, shape index: {}]   ;;  %s1172_s7 = inlined_call_operand.hbm [shape: f32[16,32], index: 7, kind: output, shape index: {}]  }
   0x1   :  { %1173 = sst [smem:[#allocation14_spill]] %s1166_s1 }
   0x2   :  { %12 = vsyncpa [#allocation5], 0 }
   0x3   :  { %14 = vsyncpa [#allocation5 + $0x1], 0 }
   0x4   :  { %15 = vsyncpa [#allocation8], 0 }
   0x5   :  { %16 = vsyncpa [#allocation6], 0 }
   0x6   :  { %18 = vsyncpa [#allocation6 + $0x1], 0  ;;  %s996_s24 = smov 0   ;;  %s998_s25 = smov 0  }
   0x7   :  { %s1000_s26 = smov 0   ;;  %s1002_s27 = smov 0  }
   0x8   :  { %s1004_s28 = smov 0   ;;  %s1006_s29 = smov 0  }
   0x9 LB: > { %s633_s30 = sadd.s32 4294967295, %s948_s29   ;;  %p635_p0 = scmp.ge.s32.totalorder %s948_s29, 1  ;;  %s948_s29 = sphi %s1006_s29, %s24_s29   ;;  %s944_s28 = sphi %s1004_s28, %s1184_s28   ;;  %s940_s27 = sphi %s1002_s27, %s1183_s27   ;;  %s936_s26 = sphi %s1000_s26, %s1182_s26   ;;  %s932_s25 = sphi %s998_s25, %s1181_s25   ;;  %s928_s24 = sphi %s996_s24, %s1180_s24  }
   0xa   : > { %p1030_p1 = scmp.eq.s32.totalorder %s633_s30, 0  ;;  %p231_p2 = scmp.lt.s32.totalorder %s948_s29, 3 }
   0xb   : > { %s1175_s1 = sld [smem:[#allocation14_spill]]  ;;  %s950_s13 = smov [#allocation7]  }
   0xc   : > { %p1038_p3 = pnand %p635_p0, %p231_p2  ;;  %s247_s14 = sshll.u32 %s950_s13, 4  ;;  %s248_s14 = int_to_ptr.vmem [resolvable:$true] %s247_s14 }
   0xd   : > { %p638_p6 = scmp.ge.s32.totalorder %s948_s29, 2  ;;  %s262_s17 = sshll.u32 %s1167_s2, 4  ;;  %s263_s17 = int_to_ptr.hbm [resolvable:$true] %s262_s17 }
   0xe   : > { %p685_p4 = pneg %p1038_p3  ;;  %s951_s18 = smov 64  }
   0xf   : > { %s952_s19 = smov 4   ;;  %s953_s20 = smov [#allocation9]  }
  0x10   : > { %p686_p5 = pnand %p685_p4, %p1030_p1  ;;  %s264_s21 = sshll.u32 %s953_s20, 4  ;;  %s265_s21 = int_to_ptr.vmem [resolvable:$true] %s264_s21 }
  0x11   : > { %s245_s11 = sshll.u32 %s1175_s1, 4  ;;  %s36_s22 = sadd.s32 1, %s944_s28  ;;  %s246_s11 = int_to_ptr.hbm [resolvable:$true] %s245_s11 }
  0x12   : > { %688 = dma.hbm_to_vmem [thread:$0]  (!%p686_p5), %s246_s11, 256, %s248_s14, [#allocation8], %s951_s18, %s951_s18, %s952_s19  }
  0x13   : > { %691 = dma.hbm_to_vmem [thread:$0]  (!%p686_p5), %s263_s17, 256, %s265_s21, [#allocation8], %s951_s18, %s951_s18, %s952_s19  }
  0x14   : > { %s634_s23 = sadd.s32 4294967294, %s948_s29   ;;  %p38_p7 = scmp.ge.s32.totalorder %s36_s22, 2 }
  0x15   : > { %s45_s9 = sadd.s32 1, %s936_s26  ;;  %p52_p8 = scmp.ne.s32.totalorder %s936_s26, %s932_s25 }
  0x16   : > { %s1186_s22 = smov (%p38_p7, %s36_s22), 0  ;;  %p53_p9 = scmp.eq.s32.totalorder %s948_s29, 0 }
  0x17   : > { %p58_p10 = scmp.ne.s32.totalorder %s932_s25, %s928_s24  ;;  %s40_s10 = ssub.s32 %s944_s28, %s1186_s22 }
  0x18   : > { %p218_p11 = scmp.eq.s32.totalorder %s633_s30, 1  ;;  %p43_p12 = scmp.eq.s32.totalorder %s40_s10, 0 }
  0x19   : > { %p1066_p13 = por %p1030_p1, %p58_p10  ;;  %p224_p2 = scmp.eq.s32.totalorder %s634_s23, 1 }
  0x1a   : > { %p1070_p0 = por %p218_p11, %p52_p8  ;;  %p54_p4 = por %p53_p9, %p52_p8 }
  0x1b   : > { %s1075_s14 = scalar_select %p43_p12, %s936_s26, %s45_s9  }
  0x1c   : > { %p1077_p5 = por %p224_p2, %p58_p10  ;;  %s290_s16 = sand.u32 1, %s936_s26  }
  0x1d   : > { %s640_s30 = sshll.u32 %s944_s28, 3  ;;  %p702_p7 = scmp.lt.s32.totalorder %s948_s29, 2 }
  0x1e   : > { %s639_s17 = sshll.u32 %s290_s16, 3  ;;  %s299_s20 = scalar_lea.hbm %s1165_s0, %s640_s30 }
  0x1f   : > { %s301_s21 = sshll.u32 %s299_s20, 4  ;;  %s294_s10 = scalar_lea.vmem [#allocation4], %s639_s17  ;;  %s302_s21 = int_to_ptr.hbm [resolvable:$true] %s301_s21 }
  0x20   : > { %s303_s1 = sshll.u32 %s294_s10, 4  ;;  %p693_p11 = pnand %p702_p7, %p54_p4  ;;  %s304_s1 = int_to_ptr.vmem [resolvable:$true] %s303_s1 }
  0x21   : > { %s291_s23 = scalar_lea.sflag [#allocation5], %s290_s16  ;;  %312 = sbr.rel (%p1038_p3) target bundleno = 488 (0x1e8), region = 48 }
  0x22   : > { %695 = dma.hbm_to_vmem [thread:$0]  (!%p693_p11), %s302_s21, 128, %s304_s1, %s291_s23  }
  0x23   : > { %s1090_s9 = sand.u32 (!%p1038_p3), 1, %s932_s25  }
  0x24   : > { %s642_s18 = sshll.u32 (!%p1038_p3), %s1090_s9, 3  ;;  %s315_s30 = scalar_lea.sflag (!%p1038_p3), [#allocation5], %s1090_s9 }
  0x25   : > { %s318_s17 = scalar_lea.vmem (!%p1038_p3), [#allocation4], %s642_s18 }
  0x26   : > { %915 = dma.done.wait (%p1066_p13), %s315_s30, 128  }
  0x27   : > { %917 = vsyncadd (%p1066_p13), %s315_s30, 4294967168 }
  0x28   : > { %919 = dma.done.wait (%p1030_p1), [#allocation8], 512  }
  0x29   : > { %921 = vsyncadd (%p1030_p1), [#allocation8], 4294966784  ;;  %vm367_vm0 = vcmask 261120   ;;  %v954_v0 = vmov 0.0   ;;  %v670_v1 = vld [vmem:[#allocation7 + $0x8] sm:$0xff]  ;;  %v669_v2 = vld [vmem:[#allocation7] sm:$0xff] }
  0x2a   : > { %368 = vst.msk [vmem:[#allocation2] sm:$0xff] %vm367_vm0, %v954_v0  ;;  %v370_v3 = vld [vmem:[%s318_s17] sm:$0xff]  ;;  %399 = vmatpush.bf16.msra.mxu0 %v670_v1  ;;  %v760_v13 = vld [vmem:[%s1168_s3] ss:$0 sm:$0xff]  ;;  %v955_v36 = vmov 32.0   ;;  %s666_s16 = sshll.u32 %s940_s27, 3 }
  0x2b   : > { %369 = vst.msk [vmem:[#allocation3] sm:$0xff] %vm367_vm0, %v954_v0  ;;  %v672_v4 = vld [vmem:[#allocation9 + $0x8] sm:$0xff]  ;;  %v671_v5 = vld [vmem:[#allocation9] sm:$0xff]  ;;  %v371_v6 = vpack.c.bf16 %v370_v3, %v370_v3  ;;  %v761_v24 = vld [vmem:[%s1169_s4] ss:$0 sm:$0xff]  ;;  %s526_s23 = scalar_lea.hbm %s1172_s7, %s666_s16  ;;  %s359_s27 = scalar_lea.vmem [#allocation10], %s642_s18 }
  0x2c   : > { %431 = vmatpush.bf16.msra.mxu1 %v672_v4  ;;  %v762_v57 = vld [vmem:[%s1170_s5] ss:$0 sm:$0xff]  ;;  %s528_s1 = sshll.u32 %s359_s27, 4  ;;  %s530_s8 = sshll.u32 %s526_s23, 4  ;;  %s529_s1 = int_to_ptr.vmem [resolvable:$true] %s528_s1  ;;  %s531_s8 = int_to_ptr.hbm [resolvable:$true] %s530_s8 }
  0x2d   : > { %v763_v60 = vld [vmem:[%s1171_s6] ss:$0 sm:$0xff]  ;;  %s516_s12 = scalar_lea.sflag [#allocation6], %s1090_s9  ;;  %s876_s11 = sshra.s32 %s531_s8, 4  ;;  %s877_s11 = int_to_ptr.hbm [resolvable:$true] %s876_s11 }
  0x2e   : > { %400 = vmatpush.bf16.msra.mxu0 %v669_v2  ;;  %s878_s16 = scalar_lea.hbm %s877_s11, 8  ;;  %s882_s18 = scalar_lea.hbm %s1172_s7, 16 }
  0x2f   : > { %p879_p1 = scmp.ne.s32.totalorder %s877_s11, %s878_s16  ;;  %p883_p9 = scmp.lt.s32.totalorder %s877_s11, %s1172_s7 }
  0x30   : > { %432 = vmatpush.bf16.msra.mxu1 %v671_v5  ;;  %p884_p10 = scmp.lt.s32.totalorder %s882_s18, %s878_s16 }
  0x31   : > { %654 = vmatmul.msk.bf16.vlgmr.msra.gmra.mxu0 %vm367_vm0, %v371_v6  ;;  %v372_v7 = vld [vmem:[#allocation2] sm:$0xff]  ;;  %p880_p3 = pnand %p879_p1, %p1070_p0 }
  0x32   : > { %v408_v8 = vld [vmem:[#allocation3] sm:$0xff]  ;;  %p885_p12 = por %p884_p10, %p883_p9 }
  0x33   : > { %663 = vmatmul.msk.bf16.vlgmr.msra.gmra.mxu1 %vm367_vm0, %v371_v6  ;;  %p881_p8 = pneg %p880_p3 }
  0x35   : > { %p886_p13 = pnand %p885_p12, %p881_p8 }
  0xae   : > { %v402_v9 = vpop.f32.mrf.mxu0 }
  0xaf   : > { %v406_v10 = vadd.f32 %v402_v9, %v372_v7 }
  0xb0   : > { %v434_v11 = vpop.f32.mrf.mxu1 }
  0xb1   : > { %v438_v12 = vadd.f32 %v434_v11, %v408_v8  ;;  %407 = vst.msk [vmem:[#allocation2] sm:$0xff] %vm367_vm0, %v406_v10 }
  0xb3   : > { %439 = vst.msk [vmem:[#allocation3] sm:$0xff] %vm367_vm0, %v438_v12 }
  0xb6   : > { %v404_v14 = vpop.f32.mrf.mxu0 }
  0xb8   : > { %v436_v15 = vpop.f32.mrf.mxu1  ;;  %v443_v16 = vld [vmem:[#allocation2] sm:$0xff] }
  0xb9   : > { %v448_v17 = vadd.f32 %v760_v13, %v443_v16 }
  0xba   : > { %v468_v26 = vld [vmem:[#allocation3] sm:$0xff] }
  0xbb   : > { %v664_v18 = vmul.f32 -1.442695, %v448_v17  ;;  %v473_v30 = vadd.f32 %v761_v24, %v468_v26 }
  0xbd   : > { %764 = vpow2.f32 %v664_v18 }
  0xc3   : > { %v765_v19 = vpop.eup %764 }
  0xc4   : > { %v452_v20 = vadd.f32 1.0, %v765_v19 }
  0xc6   : > { %766 = vrcp.f32 %v452_v20  ;;  %v464_v25 = vand.u32 2147483648, %v452_v20  ;;  %v462_v28 = vand.u32 2147483647, %v452_v20  ;;  %vm458_vm2 = vweird.f32 %v452_v20 }
  0xc7   : > { %768 = vrcp.f32 %v955_v36 }
  0xc8   : > { %v465_v31 = vor.u32 1.1754944e-38, %v464_v25  ;;  %vm463_vm4 = vcmp.eq.f32.partialorder %v462_v28, 8.507059e+37 }
  0xcc   : > { %v767_v21 = vpop.eup %766 }
  0xcd   : > { %v454_v22 = vmul.f32 %v767_v21, %v452_v20  ;;  %vm459_vm1 = vweird.f32 %v767_v21  ;;  %v769_v37 = vpop.eup %768 }
  0xce   : > { %vm460_vm3 = vmor %vm458_vm2, %vm459_vm1  ;;  %v479_v38 = vmul.f32 32.0, %v769_v37  ;;  %vm483_vm5 = vweird.f32 %v769_v37 }
  0xcf   : > { %v455_v23 = vsub.f32 1.0, %v454_v22 }
  0xd0   : > { %v480_v39 = vsub.f32 1.0, %v479_v38 }
  0xd1   : > { %v456_v27 = vmul.f32 %v767_v21, %v455_v23 }
  0xd2   : > { %v481_v40 = vmul.f32 %v769_v37, %v480_v39 }
  0xd3   : > { %v457_v29 = vadd.f32 %v767_v21, %v456_v27 }
  0xd4   : > { %v482_v41 = vadd.f32 %v769_v37, %v481_v40 }
  0xd5   : > { %v461_v32 = vsel %vm460_vm3, %v767_v21, %v457_v29 }
  0xd6   : > { %v466_v33 = vsel %vm463_vm4, %v465_v31, %v461_v32  ;;  %v484_v42 = vsel %vm483_vm5, %v769_v37, %v482_v41 }
  0xd7   : > { %v474_v34 = vmul.f32 %v473_v30, %v466_v33 }
  0xd9   : > { %v475_v35 = vsel %vm367_vm0, %v474_v34, 0.0 }
  0xda   : > { %476 = vadd.xlane.f32.xlu0 %v475_v35 }
 0x14d   : > { %v477_v43 = vpop.xlane.xlu0 %476 }
 0x14e   : > { %v485_v44 = vmul.f32 %v484_v42, %v477_v43 }
 0x150   : > { %v486_v45 = vsub.f32 %v474_v34, %v485_v44 }
 0x152   : > { %v487_v46 = vmul.f32 %v486_v45, %v486_v45 }
 0x154   : > { %v488_v47 = vsel %vm367_vm0, %v487_v46, 0.0 }
 0x155   : > { %489 = vadd.xlane.f32.xlu0 %v488_v47 }
 0x1c8   : > { %v490_v48 = vpop.xlane.xlu0 %489 }
 0x1c9   : > { %v491_v49 = vmul.f32 %v490_v48, %v484_v42 }
 0x1cb   : > { %v492_v50 = vadd.f32 1e-05, %v491_v49 }
 0x1cd   : > { %770 = vrsqrt.f32 %v492_v50  ;;  %vm499_vm7 = vweird.f32 %v492_v50 }
 0x1d3   : > { %v771_v51 = vpop.eup %770 }
 0x1d4   : > { %v494_v52 = vmul.f32 %v771_v51, %v492_v50  ;;  %vm500_vm6 = vweird.f32 %v771_v51 }
 0x1d5   : > { %vm501_vm8 = vmor %vm499_vm7, %vm500_vm6 }
 0x1d6   : > { %v495_v53 = vmul.f32 %v771_v51, %v494_v52 }
 0x1d8   : > { %v496_v54 = vmul.f32 0.5, %v495_v53 }
 0x1da   : > { %v497_v55 = vsub.f32 1.5, %v496_v54 }
 0x1dc   : > { %v498_v56 = vmul.f32 %v771_v51, %v497_v55 }
 0x1de   : > { %v502_v58 = vsel %vm501_vm8, %v771_v51, %v498_v56 }
 0x1df   : > { %v503_v59 = vmul.f32 %v502_v58, %v486_v45 }
 0x1e1   : > { %v508_v61 = vmul.f32 %v762_v57, %v503_v59 }
 0x1e3   : > { %v513_v62 = vadd.f32 %v763_v60, %v508_v61 }
 0x1e5   : > { %514 = vst.msk [vmem:[%s359_s27] sm:$0xff] %vm367_vm0, %v513_v62 }
 0x1e6   : > { %889 = shalt.err (!%p886_p13)
}
 0x1e7   : > { %683 = dma.vmem_to_hbm [thread:$0]  (%p1070_p0), %s529_s1, 128, %s531_s8, %s516_s12  }
 0x1e8 PF: > { %s542_s9 = sand.u32 1, %s928_s24   ;;  %p697_p2 = pnand %p638_p6, %p1077_p5 }
 0x1e9   : > { %s543_s23 = scalar_lea.sflag [#allocation6], %s542_s9 }
 0x1ea   : > { %p698_p4 = pneg %p697_p2 }
 0x1ec   : > { %923 = dma.done.wait (%p698_p4), %s543_s23, 128  }
 0x1ed   : > { %925 = vsyncadd (%p698_p4), %s543_s23, 4294967168  ;;  %s24_s29 = sadd.s32 1, %s948_s29   ;;  %s1180_s24 = smov %s932_s25 }
 0x1ee   : > { %p21_p7 = scmp.ge.s32.totalorder %s24_s29, 4   ;;  %s1181_s25 = smov %s936_s26 }
 0x1ef   : > { %s1182_s26 = smov %s1075_s14  ;;  %s1183_s27 = smov %s944_s28 }
 0x1f0   : > { %s1184_s28 = smov %s1186_s22  ;;  %23 = sbr.rel (!%p21_p7) target bundleno = 9 (0x9), region = 111 }
 0x1f5   :  { %549 = vsyncpa [#allocation5], 1 }
 0x1f6   :  { %551 = vsyncpa [#allocation5 + $0x1], 1 }
 0x1f7   :  { %552 = vsyncpa [#allocation8], 1 }
 0x1f8   :  { %553 = vsyncpa [#allocation6], 1 }
 0x1f9   :  { %555 = vsyncpa [#allocation6 + $0x1], 1 }

</bundles_post_ra>
